<compile_context>
chip_gen: v7x
topology: tpu7x:2x2x1
jax: 0.10.0
libtpu: 0.0.40
codegen_flags: <defaults>
</compile_context>

<pallas_src>
import functools

import jax
import jax.numpy as jnp
from jax.experimental import pallas as pl
from jax.experimental.pallas import tpu as pltpu

H1 = 16   # hidden_space1
H2 = 8    # hidden_space2


def _round_up(n, m):
    return (n + m - 1) // m * m


# ----------------------------------------------------------------------------
# Kernel
# ----------------------------------------------------------------------------
def value_net_kernel(x_ref, p_ref, out_ref, *, dp):
    """One batch tile: x_ref (dp, TB), packed params p_ref (24, C), out (1, TB)."""
    x = x_ref[...]                                   # (dp, TB) f32, batch on lanes

    # Static slices into the packed parameter buffer (zero-cost views + tiny loads).
    w1 = p_ref[0:H1, 0:dp]                           # (16, dp)  zero-padded cols
    b1 = p_ref[0:H1, dp:dp + 1]                      # (16, 1)
    w2 = p_ref[H1:H1 + H2, 0:H1]                     # (8, 16)
    b2 = p_ref[H1:H1 + H2, H1:H1 + 1]                # (8, 1)
    w3 = p_ref[H1:H1 + H2, H1 + 1:H1 + 2]            # (8, 1)   W3 stored as a column
    b3 = p_ref[H1:H1 + 1, H1 + 2:H1 + 3]             # (1, 1)

    # Layer 1: (16, dp) @ (dp, TB) -> (16, TB), lane-dense N, tile-aligned M/K.
    h1 = jnp.tanh(jnp.dot(w1, x, preferred_element_type=jnp.float32) + b1)
    # Layer 2: (8, 16) @ (16, TB) -> (8, TB).
    h2 = jnp.tanh(jnp.dot(w2, h1, preferred_element_type=jnp.float32) + b2)
    # Layer 3 on VPU/XLU: broadcast-multiply over 8 sublanes, then sublane reduce.
    v = jnp.sum(w3 * h2, axis=0, keepdims=True) + b3                     # (1, TB)

    out_ref[...] = v.astype(out_ref.dtype)


# ----------------------------------------------------------------------------
# Parameter packing: 6 tiny arrays -> one (24, C) buffer, single DMA.
# ----------------------------------------------------------------------------
def pack_params(params, dp):
    w1, b1, w2, b2, w3, b3 = params       # torch layout: W (out, in), b (out,)
    d = w1.shape[1]
    cols = max(dp + 1, H1 + 3)
    p = jnp.zeros((H1 + H2, cols), jnp.float32)
    p = p.at[0:H1, 0:d].set(w1)                       # W1 (16, D), zero-padded to dp
    p = p.at[0:H1, dp].set(b1)                        # b1 at col dp
    p = p.at[H1:H1 + H2, 0:H1].set(w2)                # W2 (8, 16)
    p = p.at[H1:H1 + H2, H1].set(b2)                  # b2 at col 16
    p = p.at[H1:H1 + H2, H1 + 1].set(w3[0, :])        # W3^T (8,) at col 17
    p = p.at[H1, H1 + 2].set(b3[0])                   # b3 at (row 16, col 18)
    return p


# ----------------------------------------------------------------------------
# Wrapper
# ----------------------------------------------------------------------------
def value_network_forward(x, params, *, max_tile_b=4096):
    """x: (B, obs_dims) float32 (PyTorch layout). Returns (B, 1) float32."""
    B, D = x.shape
    dp = _round_up(D, 8)                                  # feature dim, sublane aligned
    tb = min(_round_up(max(B, 128), 128), max_tile_b)     # batch tile, lane aligned
    b_pad = _round_up(B, tb)
    grid = (b_pad // tb,)

    # Feature-major, zero-padded input: (dp, b_pad), batch on lanes.
    xt = jnp.zeros((dp, b_pad), jnp.float32).at[:D, :B].set(x.T.astype(jnp.float32))
    p = pack_params(params, dp)

    cost = pl.CostEstimate(
        flops=2 * b_pad * (dp * H1 + H1 * H2 + H2),
        transcendentals=b_pad * (H1 + H2),
        bytes_accessed=int(xt.size * 4 + b_pad * 4 + p.size * 4),
    )

    out = pl.pallas_call(
        functools.partial(value_net_kernel, dp=dp),
        out_shape=jax.ShapeDtypeStruct((1, b_pad), jnp.float32),
        grid_spec=pltpu.PrefetchScalarGridSpec(
            num_scalar_prefetch=0,
            grid=grid,
            in_specs=[
                pl.BlockSpec((dp, tb), lambda i: (0, i)),     # batch tile of x
                pl.BlockSpec(p.shape, lambda i: (0, 0)),      # packed params, VMEM resident
            ],
            out_specs=pl.BlockSpec((1, tb), lambda i: (0, i)),
        ),
        compiler_params=pltpu.CompilerParams(
            dimension_semantics=("parallel",),                # shard batch tiles across TCs
            vmem_limit_bytes=32 * 1024 * 1024,                # safe on v5e/v6e/v7x
        ),
        cost_estimate=cost,
    )(xt, p)

    return out[0, :B].reshape(B, 1)


# ----------------------------------------------------------------------------
# Init (mirrors torch.nn.Linear default: uniform ±1/sqrt(fan_in)) and reference
# ----------------------------------------------------------------------------
def init_params(key, obs_space_dims):
    keys = jax.random.split(key, 6)

    def linear_init(kw, kb, fan_in, fan_out):
        bound = 1.0 / jnp.sqrt(jnp.float32(fan_in))
        w = jax.random.uniform(kw, (fan_out, fan_in), jnp.float32, -bound, bound)
        b = jax.random.uniform(kb, (fan_out,), jnp.float32, -bound, bound)
        return w, b

    w1, b1 = linear_init(keys[0], keys[1], obs_space_dims, H1)
    w2, b2 = linear_init(keys[2], keys[3], H1, H2)
    w3, b3 = linear_init(keys[4], keys[5], H2, 1)
    return (w1, b1, w2, b2, w3, b3)


def reference_forward(x, params):
    """Pure-JAX reference matching the PyTorch module."""
    w1, b1, w2, b2, w3, b3 = params
    h = jnp.tanh(x @ w1.T + b1)
    h = jnp.tanh(h @ w2.T + b2)
    return h @ w3.T + b3


if __name__ == "__main__":
    key = jax.random.PRNGKey(0)
    k_param, k_x1, k_x2 = jax.random.split(key, 3)

    obs_space_dims = 4   # e.g. CartPole-like observation
    params = init_params(k_param, obs_space_dims)

    # Small batch: single grid step, exercises batch/feature padding.
    x_small = jax.random.normal(k_x1, (8, obs_space_dims), jnp.float32)
    v_small = jax.block_until_ready(value_network_forward(x_small, params))
    assert v_small.shape == (8, 1)
    assert jnp.allclose(v_small, reference_forward(x_small, params),
                        atol=1e-5, rtol=1e-5), "small-batch mismatch vs reference"

    # Larger batch: exercises the batch grid (grid > 1) and non-divisible padding.
    x_big = jax.random.normal(k_x2, (5000, obs_space_dims), jnp.float32)
    v_big = jax.block_until_ready(
        value_network_forward(x_big, params, max_tile_b=2048))
    assert v_big.shape == (5000, 1)
    assert jnp.allclose(v_big, reference_forward(x_big, params),
                        atol=1e-5, rtol=1e-5), "large-batch mismatch vs reference"

    print("KERNEL_OK")
</pallas_src>

<mosaic_0001>
module attributes {stable_mosaic.version = 11 : i64} {
  func.func @value_net_kernel(%arg0: i32, %arg1: memref<8x128xf32, #tpu.memory_space<vmem>>, %arg2: memref<24x19xf32, #tpu.memory_space<vmem>>, %arg3: memref<1x128xf32, #tpu.memory_space<vmem>>) attributes {dimension_semantics = [#tpu.dimension_semantics<parallel>], iteration_bounds = array<i64: 1>, scalar_prefetch = 0 : i64, scratch_operands = 0 : i64, tpu.core_type = #tpu.core_type<tc>, window_params = [{transform_indices = @transform_0, window_bounds = array<i64: 8, 128>}, {pipeline_mode = #tpu.pipeline_mode<synchronous>, transform_indices = @transform_1, window_bounds = array<i64: 24, 19>}, {transform_indices = @transform_2, window_bounds = array<i64: 1, 128>}]} {
    %c0 = arith.constant 0 : index
    %c0_0 = arith.constant 0 : index
    %0 = vector.load %arg1[%c0, %c0_0] : memref<8x128xf32, #tpu.memory_space<vmem>>, vector<8x128xf32>
    %c0_1 = arith.constant 0 : index
    %c0_2 = arith.constant 0 : index
    %1 = vector.load %arg2[%c0_1, %c0_2] : memref<24x19xf32, #tpu.memory_space<vmem>>, vector<16x8xf32>
    %c0_3 = arith.constant 0 : index
    %c8 = arith.constant 8 : index
    %2 = vector.load %arg2[%c0_3, %c8] : memref<24x19xf32, #tpu.memory_space<vmem>>, vector<16x1xf32>
    %c16 = arith.constant 16 : index
    %c0_4 = arith.constant 0 : index
    %3 = vector.load %arg2[%c16, %c0_4] : memref<24x19xf32, #tpu.memory_space<vmem>>, vector<8x16xf32>
    %c16_5 = arith.constant 16 : index
    %c16_6 = arith.constant 16 : index
    %4 = vector.load %arg2[%c16_5, %c16_6] : memref<24x19xf32, #tpu.memory_space<vmem>>, vector<8x1xf32>
    %c16_7 = arith.constant 16 : index
    %c17 = arith.constant 17 : index
    %5 = vector.load %arg2[%c16_7, %c17] : memref<24x19xf32, #tpu.memory_space<vmem>>, vector<8x1xf32>
    %c16_8 = arith.constant 16 : index
    %c18 = arith.constant 18 : index
    %6 = vector.load %arg2[%c16_8, %c18] : memref<24x19xf32, #tpu.memory_space<vmem>>, vector<1x1xf32>
    %cst = arith.constant dense<0.000000e+00> : vector<16x128xf32>
    %7 = tpu.matmul %1, %0, %cst {dimension_numbers = #tpu.dot_dimension_numbers<[1], [0], [0], [1], [0, 0, 1, 1], [], []>} : vector<16x8xf32>, vector<8x128xf32>, vector<16x128xf32> -> vector<16x128xf32>
    %8 = vector.broadcast %2 : vector<16x1xf32> to vector<16x128xf32>
    %9 = arith.addf %7, %8 : vector<16x128xf32>
    %10 = math.tanh %9 : vector<16x128xf32>
    %cst_9 = arith.constant dense<0.000000e+00> : vector<8x128xf32>
    %11 = tpu.matmul %3, %10, %cst_9 {dimension_numbers = #tpu.dot_dimension_numbers<[1], [0], [0], [1], [0, 0, 1, 1], [], []>} : vector<8x16xf32>, vector<16x128xf32>, vector<8x128xf32> -> vector<8x128xf32>
    %12 = vector.broadcast %4 : vector<8x1xf32> to vector<8x128xf32>
    %13 = arith.addf %11, %12 : vector<8x128xf32>
    %14 = math.tanh %13 : vector<8x128xf32>
    %15 = vector.broadcast %5 : vector<8x1xf32> to vector<8x128xf32>
    %16 = arith.mulf %15, %14 : vector<8x128xf32>
    %cst_10 = arith.constant dense<0.000000e+00> : vector<128xf32>
    %17 = vector.multi_reduction <add>, %16, %cst_10 [0] : vector<8x128xf32> to vector<128xf32>
    %18 = vector.shape_cast %17 : vector<128xf32> to vector<1x128xf32>
    %19 = vector.broadcast %6 : vector<1x1xf32> to vector<1x128xf32>
    %20 = arith.addf %18, %19 : vector<1x128xf32>
    %c0_11 = arith.constant 0 : index
    %c0_12 = arith.constant 0 : index
    %21 = vector.load %arg3[%c0_11, %c0_12] : memref<1x128xf32, #tpu.memory_space<vmem>>, vector<1x128xf32>
    tpu.vector_store %arg3[%c0_11, %c0_12], %20 {strides = array<i32>} : memref<1x128xf32, #tpu.memory_space<vmem>>, vector<1x128xf32>,
    return
  }
  func.func @transform_0(%arg0: i32) -> (i32, i32) {
    %c0_i32 = arith.constant 0 : i32
    %c0_i32_0 = arith.constant 0 : i32
    return %c0_i32, %arg0 : i32, i32
  }
  func.func @transform_1(%arg0: i32) -> (i32, i32) {
    %c0_i32 = arith.constant 0 : i32
    %c0_i32_0 = arith.constant 0 : i32
    %c0_i32_1 = arith.constant 0 : i32
    return %c0_i32, %c0_i32_0 : i32, i32
  }
  func.func @transform_2(%arg0: i32) -> (i32, i32) {
    %c0_i32 = arith.constant 0 : i32
    %c0_i32_0 = arith.constant 0 : i32
    return %c0_i32, %arg0 : i32, i32
  }
}

</mosaic_0001>

<bundles_post_ra>
// kernel: tpu_custom_call.1
= control target key start
LH: loop header
LB: loop body
LE: loop exit
PB: predicated region body
PF: predicated region fallthrough
CT: control target
= control target key end

     0   :  { %7 = vsyncpa [#allocation3], 0  ;;  %s436_s0 = inlined_call_operand.hbm [shape: f32[8,128], index: 0, kind: input, shape index: {}]   ;;  %s437_s1 = inlined_call_operand.hbm [shape: f32[24,19], index: 1, kind: input, shape index: {}]   ;;  %s438_s2 = inlined_call_operand.hbm [shape: f32[1,128], index: 2, kind: output, shape index: {}]  }
   0x1   :  { %8 = vsyncpa [#allocation6], 0 }
   0x2   :  { %9 = vsyncpa [#allocation4], 0  ;;  %s366_s9 = smov [#allocation2]   ;;  %s367_s11 = smov [#allocation5]  }
   0x3   :  { %s16_s10 = sshll.u32 %s366_s9, 4  ;;  %s25_s12 = sshll.u32 %s367_s11, 4  ;;  %s17_s10 = int_to_ptr.vmem [resolvable:$true] %s16_s10  ;;  %s393_s12 = int_to_ptr.vmem [resolvable:$true] %s25_s12 }
   0x4   :  { %s294_s15 = scalar_lea.hbm %s436_s0, 128 }
   0x5   :  { %p295_p0 = scmp.ne.s32.totalorder %s436_s0, %s294_s15  ;;  %p298_p1 = scmp.lt.u32.totalorder %s294_s15, %s436_s0 }
   0x7   :  { %p300_p2 = pnand %p298_p1, %p295_p0 }
   0x9   :  { %303 = shalt.err (!%p300_p2)
}
   0xa   :  { %s304_s20 = scalar_lea.vmem %s17_s10, 128  ;;  %p309_p4 = scmp.lt.s32.totalorder %s17_s10, %s17_s10 }
   0xb   :  { %p305_p3 = scmp.ne.s32.totalorder %s17_s10, %s304_s20  ;;  %p310_p5 = scmp.lt.s32.totalorder %s304_s20, %s304_s20 }
   0xd   :  { %p311_p6 = por %p310_p5, %p309_p4 }
   0xf   :  { %p312_p7 = pnand %p311_p6, %p305_p3 }
  0x11   :  { %315 = shalt.err (!%p312_p7)
}
  0x12   :  { %19 = dma.hbm_to_vmem [thread:$0]  %s436_s0, 128, %s17_s10, [#allocation3]  }
  0x13   :  { %s316_s25 = scalar_lea.hbm %s437_s1, 384 }
  0x14   :  { %p317_p8 = scmp.ne.s32.totalorder %s437_s1, %s316_s25  ;;  %p320_p9 = scmp.lt.u32.totalorder %s316_s25, %s437_s1 }
  0x16   :  { %p322_p10 = pnand %p320_p9, %p317_p8 }
  0x18   :  { %325 = shalt.err (!%p322_p10)
}
  0x19   :  { %s326_s30 = scalar_lea.vmem %s393_s12, 384  ;;  %p331_p12 = scmp.lt.s32.totalorder %s393_s12, %s393_s12 }
  0x1a   :  { %p327_p11 = scmp.ne.s32.totalorder %s393_s12, %s326_s30  ;;  %p332_p13 = scmp.lt.s32.totalorder %s326_s30, %s326_s30 }
  0x1c   :  { %p333_p0 = por %p332_p13, %p331_p12 }
  0x1e   :  { %p334_p1 = pnand %p333_p0, %p327_p11 }
  0x20   :  { %337 = shalt.err (!%p334_p1)
}
  0x21   :  { %s368_s0 = smov 128   ;;  %s369_s3 = smov 8  }
  0x22   :  { %31 = dma.hbm_to_vmem [thread:$0]  %s437_s1, 384, %s393_s12, [#allocation6], %s368_s0, %s368_s0, %s369_s3  }
  0x23   :  { %360 = dma.done.wait [#allocation3], 128  }
  0x24   :  { %361 = vsyncadd [#allocation3], 4294967168 }
  0x25   :  { %362 = dma.done.wait [#allocation6], 384  }
  0x26   :  { %363 = vsyncadd [#allocation6], 4294966912  ;;  %v370_v0 = vmov 8   ;;  %vm53_vm0 = vcmask 64512   ;;  %v38_v1 = vld [vmem:[#allocation2] sm:$0xff]  ;;  %v39_v2 = vld [vmem:[#allocation5] sm:$0xff] }
  0x27   :  { %284 = vset.pattern.permute.xlu0 %v370_v0  ;;  %v40_v3 = vld [vmem:[#allocation5 + $0x8] sm:$0xff]  ;;  %257 = vmatprep.subr.mxu0 %v38_v1  ;;  %v371_v4 = vmov 0.0|0.0   ;;  %vm372_vm1 = vmmov 0   ;;  %v373_v5 = vmov 0.0   ;;  %v42_v6 = vld [vmem:[#allocation5 + $0x10] sm:$0x1] }
  0x28   :  { %259 = vmatprep.mubr.msk.f32.mxu0 %vm53_vm0, %v39_v2  ;;  %258 = vmatpush3.msra.mxu0 %v38_v1  ;;  %v41_v7 = vld [vmem:[#allocation5 + $0x10] sm:$0xff]  ;;  %v374_v8 = vmov 16   ;;  %v375_v9 = vmov 18   ;;  %v376_v10 = vmov 17   ;;  %vm140_vm2 = vcmask 130048   ;;  %s377_s1 = smov [#allocation7]  }
  0x29   :  { %45 = vperm.xlu0 %284, %v39_v2   ;;  %260 = vmatmul.mubr.msk.f32.vlgmr.msra.gmra.mrb[0].mxu0 %vm53_vm0, %v40_v3  ;;  %s238_s6 = sshll.u32 %s377_s1, 4  ;;  %s239_s6 = int_to_ptr.vmem [resolvable:$true] %s238_s6 }
  0x2a   :  { %269 = vmatprep.subr.bf16.mxu1 %v371_v4  ;;  %266 = vmatprep.mubr.msk.f32.mxu1 %vm372_vm1, %v373_v5  ;;  %s338_s7 = scalar_lea.vmem %s239_s6, 16  ;;  %s342_s8 = scalar_lea.vmem %s239_s6, 32 }
  0x2b   :  { %285 = vset.pattern.permute.xlu1 %v374_v8  ;;  %p339_p2 = scmp.ne.s32.totalorder %s239_s6, %s338_s7  ;;  %p343_p3 = scmp.lt.s32.totalorder %s239_s6, %s239_s6 }
  0x2c   :  { %137 = vperm.xlu1 %285, %v41_v7   ;;  %p344_p4 = scmp.lt.s32.totalorder %s342_s8, %s338_s7 }
  0x2d   :  { %50 = vperm.xlu0 %284, %v40_v3  }
  0x2e   :  { %p345_p5 = por %p344_p4, %p343_p3 }
  0x30   :  { %286 = vset.pattern.permute.xlu1 %v376_v10  ;;  %p346_p6 = pnand %p345_p5, %p339_p2 }
  0x31   :  { %287 = vset.pattern.permute.xlu0 %v375_v9  ;;  %215 = vperm.xlu1 %286, %v41_v7  }
  0x32   :  { %227 = vperm.xlu0 %287, %v42_v6  }
  0xa8   :  { %v46_v11 = vpop.permute.xlu0 %45 }
  0xab   :  { %v138_v20 = vpop.permute.xlu1 %137 }
  0xac   :  { %v51_v12 = vpop.permute.xlu0 %50 }
  0xb0   :  { %v216_v24 = vpop.permute.xlu1 %215 }
  0xb1   :  { %v228_v32 = vpop.permute.xlu0 %227 }
  0xfc   :  { %v261_v13 = vpop.f32.mrb[0].mxu0 }
  0xfd   :  { %v130_v14 = vadd.f32 %v261_v13, %v51_v12  ;;  %v124_v15 = vpop.f32.mrb[1].mxu0 }
  0xfe   :  { %v125_v16 = vadd.f32 %v124_v15, %v46_v11 }
  0xff   :  { %288 = vtanh.f32 %v130_v14 }
 0x100   :  { %290 = vtanh.f32 %v125_v16 }
 0x109   :  { %v289_v17 = vpop.eup %288 }
 0x10a   :  { %v291_v18 = vpop.eup %290 }
 0x10b   :  { %v270_v19 = vpack.c.bf16 %v289_v17, %v291_v18 }
 0x10d   :  { %271 = vmatpush3.bf16.msra.mxu1 %v270_v19 }
 0x110   :  { %267 = vmatmul.mubr.msk.f32.vlgmr.msra.gmra.mrb[0].mxu1 %vm140_vm2, %v41_v7 }
 0x1e3   :  { %v209_v21 = vpop.f32.mrb[0].mxu1 }
 0x1e4   :  { %v210_v22 = vadd.f32 %v209_v21, %v138_v20  ;;  %v268_v23 = vpop.f32.mrb[1].mxu1 }
 0x1e6   :  { %292 = vtanh.f32 %v210_v22 }
 0x1f0   :  { %v293_v25 = vpop.eup %292 }
 0x1f1   :  { %v218_v26 = vmul.f32 %v293_v25, %v216_v24 }
 0x1f3   :  { %v219_v27 = vrot.slane %v218_v26, 4 }
 0x1f5   :  { %v220_v28 = vadd.f32 %v219_v27, %v218_v26 }
 0x1f7   :  { %v221_v29 = vrot.slane %v220_v28, 2 }
 0x1f9   :  { %v222_v30 = vadd.f32 %v221_v29, %v220_v28 }
 0x1fb   :  { %v223_v31 = vrot.slane %v222_v30, 1 }
 0x1fd   :  { %v224_v33 = vadd.f32 %v223_v31, %v222_v30 }
 0x1ff   :  { %v230_v34 = vadd.f32 %v228_v32, %v224_v33 }
 0x201   :  { %231 = vst [vmem:[#allocation7] sm:$0x1] %v230_v34 }
 0x202   :  { %349 = shalt.err (!%p346_p6)
}
 0x203   :  { %s350_s11 = scalar_lea.hbm %s438_s2, 16 }
 0x204   :  { %p351_p7 = scmp.ne.s32.totalorder %s438_s2, %s350_s11  ;;  %p354_p8 = scmp.lt.u32.totalorder %s350_s11, %s438_s2 }
 0x206   :  { %p356_p9 = pnand %p354_p8, %p351_p7 }
 0x208   :  { %359 = shalt.err (!%p356_p9)
}
 0x209   :  { %241 = dma.vmem_to_hbm [thread:$0]  %s239_s6, 16, %s438_s2, [#allocation4]  }
 0x20a   :  { %364 = dma.done.wait [#allocation4], 16  }
 0x20b   :  { %365 = vsyncadd [#allocation4], 4294967280 }
 0x20c   :  { %245 = vsyncpa [#allocation3], 1 }
 0x20d   :  { %246 = vsyncpa [#allocation6], 1 }
 0x20e   :  { %247 = vsyncpa [#allocation4], 1 }

</bundles_post_ra>
